<compile_context>
chip_gen: v7x
topology: tpu7x:2x2x1
jax: 0.10.0
libtpu: 0.0.40
codegen_flags: <defaults>
</compile_context>

<pallas_src>
import functools

import jax
import jax.numpy as jnp
from jax.experimental import pallas as pl
from jax.experimental.pallas import tpu as pltpu

K_CHEB = 5  # Chebyshev filter order used by the PyTorch module (GConvLSTM(..., 5))


# -----------------------------------------------------------------------------
# Pallas kernel: the whole GConvLSTM stack (all layers, fused)
# -----------------------------------------------------------------------------
def _gconv_lstm_model_kernel(l_ref, x_ref, w_ref, b_ref, wco_ref, hc_ref):
    # l_ref  : [N, N]   f32   dense scaled Laplacian L_hat
    # x_ref  : [N, Dh]  f32   layer-0 input (node embedding zero-padded to Dh)
    # w_ref  : [L, K*Dh, 4*Dh] bf16  fused X-side ChebConv weights
    #                                (per-k row blocks, gates i|f|c|o on lanes)
    # b_ref  : [L, N, 4*Dh] f32  biases + full H0-side contribution + i/f peephole
    # wco_ref: [L, 1, Dh]  f32  o-gate peephole weights (applied to C_new)
    # hc_ref : [N, L*2*Dh] f32  packed output [H0|C0|H1|C1|...], lane-dense
    n_layers = w_ref.shape[0]
    n, dh = x_ref.shape

    # --- One-time (hoisted out of the layer loop): Chebyshev matrices of L ---
    # T_0 = I, T_1 = L, T_k = 2 L T_{k-1} - T_{k-2}.  Kept in f32 for stability.
    L = l_ref[...]
    eye = (jax.lax.broadcasted_iota(jnp.int32, (n, n), 0) ==
           jax.lax.broadcasted_iota(jnp.int32, (n, n), 1)).astype(jnp.float32)
    t_mats = [eye, L]
    for _ in range(2, K_CHEB):
        t_mats.append(2.0 * jnp.dot(L, t_mats[-1],
                                    preferred_element_type=jnp.float32)
                      - t_mats[-2])
    # Stacked propagator for k = 1..K-1 (k = 0 term is just `cur` itself).
    pv = jnp.concatenate(t_mats[1:], axis=0).astype(jnp.bfloat16)  # [(K-1)*N, N]

    cur = x_ref[...]                                               # f32 [N, Dh]
    outs = []
    # Static layer loop: H/C live in vregs/VMEM between layers (fine for L<=4).
    # TODO(synk): switch to lax.fori_loop / a layer grid axis for deep stacks.
    for l in range(n_layers):
        wl = w_ref[l]                                              # bf16 [K*Dh, 4Dh]
        curb = cur.astype(jnp.bfloat16)

        # Stacked Chebyshev basis in ONE MXU matmul: [(K-1)*N, N] @ [N, Dh].
        basis = jnp.dot(pv, curb, preferred_element_type=jnp.float32)
        basis_b = basis.astype(jnp.bfloat16)

        # Gate pre-activations.  b_ref[l] already folds bx+bh+bg, the whole
        # H0-side ChebConv (rank-1 since H0 = ones) and the i/f peephole
        # (C0 = ones).  Accumulate the X side from static-slice views (no
        # lane concat of the basis).
        s = b_ref[l] + jnp.dot(curb, wl[:dh, :],
                               preferred_element_type=jnp.float32)
        for k in range(1, K_CHEB):
            s = s + jnp.dot(basis_b[(k - 1) * n:k * n, :],
                            wl[k * dh:(k + 1) * dh, :],
                            preferred_element_type=jnp.float32)

        # gate lane order: [ i | f | c | o ];  C0 = ones  =>  C_new = F + I*T
        ifg = jax.nn.sigmoid(s[:, :2 * dh])
        i_g = ifg[:, :dh]
        f_g = ifg[:, dh:2 * dh]
        c_hat = jnp.tanh(s[:, 2 * dh:3 * dh])
        c_new = f_g + i_g * c_hat
        o_g = jax.nn.sigmoid(s[:, 3 * dh:] + wco_ref[l] * c_new)
        h_relu = jnp.maximum(o_g * jnp.tanh(c_new), 0.0)  # model applies F.relu(h)

        outs += [h_relu, c_new]
        cur = h_relu

    # Single lane-dense (multiple-of-128) store instead of per-layer 64-wide ones.
    hc_ref[...] = jnp.concatenate(outs, axis=-1)                   # [N, L*2*Dh]


def gconv_lstm_model_call(l_hat, x_pad, w_all, b_all, wco_all):
    n_layers = w_all.shape[0]
    n, dh = x_pad.shape
    vmem = pl.BlockSpec(memory_space=pltpu.MemorySpace.VMEM)
    # TODO(synk): production-size graphs: grid over destination-node row tiles
    # (dimension_semantics=("parallel",) for v7x megacore) + vmem_limit_bytes.
    return pl.pallas_call(
        _gconv_lstm_model_kernel,
        out_shape=jax.ShapeDtypeStruct((n, n_layers * 2 * dh), jnp.float32),
        in_specs=[vmem] * 5,
        out_specs=vmem,
    )(l_hat, x_pad, w_all, b_all, wco_all)


# -----------------------------------------------------------------------------
# Glue: graph normalization (ChebConv "sym", lambda_max=2.0), params, fusion
# -----------------------------------------------------------------------------
def build_cheb_lhat(edge_index, edge_weight, n_nodes):
    src = edge_index[0]
    dst = edge_index[1]
    no_loop = (src != dst).astype(jnp.float32)
    w = edge_weight.astype(jnp.float32) * no_loop            # remove self loops
    deg = jnp.zeros((n_nodes,), jnp.float32).at[src].add(w)
    dis = jnp.where(deg > 0.0, 1.0 / jnp.sqrt(deg), 0.0)
    wn = -dis[src] * w * dis[dst]                            # sym-normalized off-diag
    # lambda_max = 2.0 => scale 2/lambda_max = 1; diag (=1) - 1 = 0
    lhat = jnp.zeros((n_nodes, n_nodes), jnp.float32).at[dst, src].add(wn)
    return lhat


def init_params(key, input_dim, hidden_dim, n_layers, n_nodes):
    keys = jax.random.split(key, 1 + 6 * n_layers)
    params = {
        # nn.Embedding(n_nodes, input_dim), uniform(-1, 1)
        "node_embedding": jax.random.uniform(
            keys[0], (n_nodes, input_dim), jnp.float32, -1.0, 1.0),
        "layers": [],
    }
    for l in range(n_layers):
        d_in = input_dim if l == 0 else hidden_dim
        k = keys[1 + 6 * l: 1 + 6 * (l + 1)]
        scale_x = 1.0 / jnp.sqrt(jnp.float32(d_in * K_CHEB))
        scale_h = 1.0 / jnp.sqrt(jnp.float32(hidden_dim * K_CHEB))
        wc = jax.random.normal(k[2], (4, 1, hidden_dim), jnp.float32) * 0.1
        wc = wc.at[2].set(0.0)  # no peephole on the cell candidate
        params["layers"].append({
            "wx": jax.random.normal(k[0], (4 * K_CHEB, d_in, hidden_dim),
                                    jnp.float32) * scale_x,
            "wh": jax.random.normal(k[1], (4 * K_CHEB, hidden_dim, hidden_dim),
                                    jnp.float32) * scale_h,
            "wc": wc,
            "bx": jax.random.normal(k[3], (4, 1, hidden_dim), jnp.float32) * 0.01,
            "bh": jax.random.normal(k[4], (4, 1, hidden_dim), jnp.float32) * 0.01,
            "bg": jax.random.normal(k[5], (4, 1, hidden_dim), jnp.float32) * 0.01,
        })
    return params


def fuse_params(params, l_hat, hidden_dim):
    """Fold per-gate ChebConv weights into lane-dense slabs and pre-compute the
    entire H0-side contribution (H0 = C0 = ones => rank-1 basis) + i/f peephole
    into a per-layer additive bias b_all[L, N, 4*Dh]."""
    n = l_hat.shape[0]
    # Chebyshev basis of the all-ones vector: t_0 = 1, t_1 = L@1, recursion.
    ones_n = jnp.ones((n,), jnp.float32)
    tvecs = [ones_n, l_hat @ ones_n]
    for _ in range(2, K_CHEB):
        tvecs.append(2.0 * (l_hat @ tvecs[-1]) - tvecs[-2])
    tmat = jnp.stack(tvecs, axis=1)                               # [N, K]

    ws, bs, wcos = [], [], []
    for lp in params["layers"]:
        wx, wh, wc = lp["wx"], lp["wh"], lp["wc"]
        d_in = wx.shape[1]
        # zero-pad layer-0 contraction rows so every layer has the same shape
        wx = jnp.pad(wx, ((0, 0), (0, hidden_dim - d_in), (0, 0)))
        # X-side fused weight slab [K*Dh, 4*Dh], stored bf16 for the MXU.
        ws.append(jnp.concatenate(
            [jnp.concatenate([wx[g * K_CHEB + k] for g in range(4)], axis=1)
             for k in range(K_CHEB)], axis=0).astype(jnp.bfloat16))
        # H-side collapses to column sums because T_k(ones) is rank-1.
        wh_cs = jnp.stack(
            [jnp.concatenate([jnp.sum(wh[g * K_CHEB + k], axis=0)
                              for g in range(4)], axis=-1)
             for k in range(K_CHEB)], axis=0)                     # [K, 4*Dh]
        bias = jnp.concatenate(
            [lp["bx"][g] + lp["bh"][g] + lp["bg"][g] for g in range(4)], axis=-1)
        peep_if = jnp.concatenate(
            [wc[0], wc[1], jnp.zeros_like(wc[2]), jnp.zeros_like(wc[3])], axis=-1)
        bs.append(tmat @ wh_cs + bias + peep_if)                  # [N, 4*Dh]
        wcos.append(wc[3])                                        # [1, Dh]
    return jnp.stack(ws), jnp.stack(bs), jnp.stack(wcos)


@functools.partial(jax.jit, static_argnames=("n_layers", "n_nodes", "hidden_dim"))
def gconv_lstm_model_forward(params, edge_index, edge_weight,
                             n_layers, n_nodes, hidden_dim):
    input_dim = params["node_embedding"].shape[1]
    assert input_dim <= hidden_dim, "zero-padding assumes input_dim <= hidden_dim"
    l_hat = build_cheb_lhat(edge_index, edge_weight, n_nodes)
    x_pad = jnp.pad(params["node_embedding"],
                    ((0, 0), (0, hidden_dim - input_dim)))
    w_all, b_all, wco_all = fuse_params(params, l_hat, hidden_dim)
    hc = gconv_lstm_model_call(l_hat, x_pad, w_all, b_all, wco_all)
    hidden_states = [
        (hc[:, (2 * l) * hidden_dim:(2 * l + 1) * hidden_dim],
         hc[:, (2 * l + 1) * hidden_dim:(2 * l + 2) * hidden_dim])
        for l in range(n_layers)]
    out = hidden_states[-1][0]
    # TODO(synk): self.decoder is constructed in __init__ but never used in forward(); omitted.
    return out, hidden_states, []


# -----------------------------------------------------------------------------
# Pure-JAX reference (original per-gate f32 formulation) for a correctness check
# -----------------------------------------------------------------------------
def _reference_forward(params, l_hat, n_layers, n_nodes, hidden_dim):
    cur = params["node_embedding"]
    hs = []
    for l in range(n_layers):
        lp = params["layers"][l]
        H = jnp.ones((n_nodes, hidden_dim), jnp.float32)
        C = jnp.ones((n_nodes, hidden_dim), jnp.float32)

        def cheb(inp):
            Ts = [inp, l_hat @ inp]
            for _ in range(2, K_CHEB):
                Ts.append(2.0 * (l_hat @ Ts[-1]) - Ts[-2])
            return Ts

        Tx, Th = cheb(cur), cheb(H)

        def conv(Ts, w, b, g):
            acc = Ts[0] @ w[g * K_CHEB]
            for k in range(1, K_CHEB):
                acc = acc + Ts[k] @ w[g * K_CHEB + k]
            return acc + b[g]

        gx = [conv(Tx, lp["wx"], lp["bx"], g) for g in range(4)]
        gh = [conv(Th, lp["wh"], lp["bh"], g) for g in range(4)]
        I = jax.nn.sigmoid(gx[0] + gh[0] + lp["wc"][0] * C + lp["bg"][0])
        Fg = jax.nn.sigmoid(gx[1] + gh[1] + lp["wc"][1] * C + lp["bg"][1])
        T = jnp.tanh(gx[2] + gh[2] + lp["bg"][2])
        C = Fg * C + I * T
        O = jax.nn.sigmoid(gx[3] + gh[3] + lp["wc"][3] * C + lp["bg"][3])
        Hr = jnp.maximum(O * jnp.tanh(C), 0.0)
        hs.append((Hr, C))
        cur = Hr
    return hs[-1][0], hs


if __name__ == "__main__":
    n_nodes, input_dim, hidden_dim, n_layers, output_dim = 16, 8, 32, 2, 4

    # Deterministic ring graph (both directions), unit weights.
    idx = jnp.arange(n_nodes, dtype=jnp.int32)
    src = jnp.concatenate([idx, (idx + 1) % n_nodes])
    dst = jnp.concatenate([(idx + 1) % n_nodes, idx])
    edge_index = jnp.stack([src, dst], axis=0)               # [2, 32]
    edge_weight = jnp.ones((edge_index.shape[1],), jnp.float32)

    params = init_params(jax.random.PRNGKey(0), input_dim, hidden_dim,
                         n_layers, n_nodes)

    out, hidden_states, _extras = gconv_lstm_model_forward(
        params, edge_index, edge_weight, n_layers, n_nodes, hidden_dim)
    jax.block_until_ready(out)

    assert out.shape == (n_nodes, hidden_dim)
    assert len(hidden_states) == n_layers

    # Correctness check against the un-fused pure-JAX f32 reference.
    # Tolerance is 2e-2 because the kernel uses bf16 MXU operands with f32
    # accumulation (perf-review item); elementwise math stays f32.
    l_hat = build_cheb_lhat(edge_index, edge_weight, n_nodes)
    ref_out, ref_hs = _reference_forward(params, l_hat, n_layers, n_nodes,
                                         hidden_dim)
    assert jnp.allclose(out, ref_out, atol=2e-2, rtol=2e-2)
    for l in range(n_layers):
        assert jnp.allclose(hidden_states[l][0], ref_hs[l][0], atol=2e-2, rtol=2e-2)
        assert jnp.allclose(hidden_states[l][1], ref_hs[l][1], atol=2e-2, rtol=2e-2)

    print("KERNEL_OK")
</pallas_src>

<mosaic_0001>
module attributes {stable_mosaic.version = 11 : i64} {
  func.func private @main(%arg0: i32) attributes {dimension_semantics = [#tpu.dimension_semantics<core_parallel>], iteration_bounds = array<i64: 2>, tpu.core_type = #tpu.core_type<sc_scalar_subcore>, window_params = []} {
    return
  }
}

module attributes {stable_mosaic.version = 11 : i64} {
  func.func private @main(%arg0: i32) attributes {dimension_semantics = [#tpu.dimension_semantics<core_parallel>], iteration_bounds = array<i64: 2>, tpu.core_type = #tpu.core_type<sc_scalar_subcore>, window_params = []} {
    return
  }
}

module attributes {stable_mosaic.version = 11 : i64} {
  func.func @_gconv_lstm_model_kernel(%arg0: memref<16x16xf32, #tpu.memory_space<vmem>>, %arg1: memref<16x32xf32, #tpu.memory_space<vmem>>, %arg2: memref<2x160x128xbf16, #tpu.memory_space<vmem>>, %arg3: memref<2x16x128xf32, #tpu.memory_space<vmem>>, %arg4: memref<2x1x32xf32, #tpu.memory_space<vmem>>, %arg5: memref<16x128xf32, #tpu.memory_space<vmem>>) attributes {dimension_semantics = [], scalar_prefetch = 0 : i64, scratch_operands = 0 : i64, tpu.core_type = #tpu.core_type<tc>} {
    %c0 = arith.constant 0 : index
    %c0_0 = arith.constant 0 : index
    %0 = vector.load %arg0[%c0, %c0_0] : memref<16x16xf32, #tpu.memory_space<vmem>>, vector<16x16xf32>
    %1 = tpu.iota {dimensions = array<i32: 0>} : vector<16x16xi32>
    %2 = tpu.iota {dimensions = array<i32: 1>} : vector<16x16xi32>
    %3 = arith.cmpi eq, %1, %2 : vector<16x16xi32>
    %4 = arith.extui %3 : vector<16x16xi1> to vector<16x16xi32>
    %5 = arith.sitofp %4 : vector<16x16xi32> to vector<16x16xf32>
    %cst = arith.constant dense<0.000000e+00> : vector<16x16xf32>
    %6 = tpu.matmul %0, %0, %cst {dimension_numbers = #tpu.dot_dimension_numbers<[1], [0], [0], [1], [0, 0, 1, 1], [], []>} : vector<16x16xf32>, vector<16x16xf32>, vector<16x16xf32> -> vector<16x16xf32>
    %cst_1 = arith.constant 2.000000e+00 : f32
    %7 = vector.broadcast %cst_1 : f32 to vector<16x16xf32>
    %8 = arith.mulf %7, %6 : vector<16x16xf32>
    %9 = arith.subf %8, %5 : vector<16x16xf32>
    %cst_2 = arith.constant dense<0.000000e+00> : vector<16x16xf32>
    %10 = tpu.matmul %0, %9, %cst_2 {dimension_numbers = #tpu.dot_dimension_numbers<[1], [0], [0], [1], [0, 0, 1, 1], [], []>} : vector<16x16xf32>, vector<16x16xf32>, vector<16x16xf32> -> vector<16x16xf32>
    %cst_3 = arith.constant 2.000000e+00 : f32
    %11 = vector.broadcast %cst_3 : f32 to vector<16x16xf32>
    %12 = arith.mulf %11, %10 : vector<16x16xf32>
    %13 = arith.subf %12, %0 : vector<16x16xf32>
    %cst_4 = arith.constant dense<0.000000e+00> : vector<16x16xf32>
    %14 = tpu.matmul %0, %13, %cst_4 {dimension_numbers = #tpu.dot_dimension_numbers<[1], [0], [0], [1], [0, 0, 1, 1], [], []>} : vector<16x16xf32>, vector<16x16xf32>, vector<16x16xf32> -> vector<16x16xf32>
    %cst_5 = arith.constant 2.000000e+00 : f32
    %15 = vector.broadcast %cst_5 : f32 to vector<16x16xf32>
    %16 = arith.mulf %15, %14 : vector<16x16xf32>
    %17 = arith.subf %16, %9 : vector<16x16xf32>
    %18 = tpu.concatenate %0, %9, %13, %17 in 0 : vector<16x16xf32>, vector<16x16xf32>, vector<16x16xf32>, vector<16x16xf32> -> vector<64x16xf32>
    %19 = arith.truncf %18 : vector<64x16xf32> to vector<64x16xbf16>
    %c0_6 = arith.constant 0 : index
    %c0_7 = arith.constant 0 : index
    %20 = vector.load %arg1[%c0_6, %c0_7] : memref<16x32xf32, #tpu.memory_space<vmem>>, vector<16x32xf32>
    %c0_8 = arith.constant 0 : index
    %c0_9 = arith.constant 0 : index
    %c0_10 = arith.constant 0 : index
    %21 = vector.load %arg2[%c0_8, %c0_9, %c0_10] : memref<2x160x128xbf16, #tpu.memory_space<vmem>>, vector<1x160x128xbf16>
    %22 = vector.shape_cast %21 : vector<1x160x128xbf16> to vector<160x128xbf16>
    %23 = arith.truncf %20 : vector<16x32xf32> to vector<16x32xbf16>
    %cst_11 = arith.constant dense<0.000000e+00> : vector<64x32xf32>
    %24 = tpu.matmul %19, %23, %cst_11 {dimension_numbers = #tpu.dot_dimension_numbers<[1], [0], [0], [1], [0, 0, 1, 1], [], []>} : vector<64x16xbf16>, vector<16x32xbf16>, vector<64x32xf32> -> vector<64x32xf32>
    %25 = arith.truncf %24 : vector<64x32xf32> to vector<64x32xbf16>
    %c0_12 = arith.constant 0 : index
    %c0_13 = arith.constant 0 : index
    %c0_14 = arith.constant 0 : index
    %26 = vector.load %arg3[%c0_12, %c0_13, %c0_14] : memref<2x16x128xf32, #tpu.memory_space<vmem>>, vector<1x16x128xf32>
    %27 = vector.shape_cast %26 : vector<1x16x128xf32> to vector<16x128xf32>
    %28 = vector.extract_strided_slice %22 {offsets = [0, 0], sizes = [32, 128], strides = [1, 1]} : vector<160x128xbf16> to vector<32x128xbf16>
    %cst_15 = arith.constant dense<0.000000e+00> : vector<16x128xf32>
    %29 = tpu.matmul %23, %28, %cst_15 {dimension_numbers = #tpu.dot_dimension_numbers<[1], [0], [0], [1], [0, 0, 1, 1], [], []>} : vector<16x32xbf16>, vector<32x128xbf16>, vector<16x128xf32> -> vector<16x128xf32>
    %30 = arith.addf %27, %29 : vector<16x128xf32>
    %31 = vector.extract_strided_slice %25 {offsets = [0, 0], sizes = [16, 32], strides = [1, 1]} : vector<64x32xbf16> to vector<16x32xbf16>
    %32 = vector.extract_strided_slice %22 {offsets = [32, 0], sizes = [32, 128], strides = [1, 1]} : vector<160x128xbf16> to vector<32x128xbf16>
    %cst_16 = arith.constant dense<0.000000e+00> : vector<16x128xf32>
    %33 = tpu.matmul %31, %32, %cst_16 {dimension_numbers = #tpu.dot_dimension_numbers<[1], [0], [0], [1], [0, 0, 1, 1], [], []>} : vector<16x32xbf16>, vector<32x128xbf16>, vector<16x128xf32> -> vector<16x128xf32>
    %34 = arith.addf %30, %33 : vector<16x128xf32>
    %35 = vector.extract_strided_slice %25 {offsets = [16, 0], sizes = [16, 32], strides = [1, 1]} : vector<64x32xbf16> to vector<16x32xbf16>
    %36 = vector.extract_strided_slice %22 {offsets = [64, 0], sizes = [32, 128], strides = [1, 1]} : vector<160x128xbf16> to vector<32x128xbf16>
    %cst_17 = arith.constant dense<0.000000e+00> : vector<16x128xf32>
    %37 = tpu.matmul %35, %36, %cst_17 {dimension_numbers = #tpu.dot_dimension_numbers<[1], [0], [0], [1], [0, 0, 1, 1], [], []>} : vector<16x32xbf16>, vector<32x128xbf16>, vector<16x128xf32> -> vector<16x128xf32>
    %38 = arith.addf %34, %37 : vector<16x128xf32>
    %39 = vector.extract_strided_slice %25 {offsets = [32, 0], sizes = [16, 32], strides = [1, 1]} : vector<64x32xbf16> to vector<16x32xbf16>
    %40 = vector.extract_strided_slice %22 {offsets = [96, 0], sizes = [32, 128], strides = [1, 1]} : vector<160x128xbf16> to vector<32x128xbf16>
    %cst_18 = arith.constant dense<0.000000e+00> : vector<16x128xf32>
    %41 = tpu.matmul %39, %40, %cst_18 {dimension_numbers = #tpu.dot_dimension_numbers<[1], [0], [0], [1], [0, 0, 1, 1], [], []>} : vector<16x32xbf16>, vector<32x128xbf16>, vector<16x128xf32> -> vector<16x128xf32>
    %42 = arith.addf %38, %41 : vector<16x128xf32>
    %43 = vector.extract_strided_slice %25 {offsets = [48, 0], sizes = [16, 32], strides = [1, 1]} : vector<64x32xbf16> to vector<16x32xbf16>
    %44 = vector.extract_strided_slice %22 {offsets = [128, 0], sizes = [32, 128], strides = [1, 1]} : vector<160x128xbf16> to vector<32x128xbf16>
    %cst_19 = arith.constant dense<0.000000e+00> : vector<16x128xf32>
    %45 = tpu.matmul %43, %44, %cst_19 {dimension_numbers = #tpu.dot_dimension_numbers<[1], [0], [0], [1], [0, 0, 1, 1], [], []>} : vector<16x32xbf16>, vector<32x128xbf16>, vector<16x128xf32> -> vector<16x128xf32>
    %46 = arith.addf %42, %45 : vector<16x128xf32>
    %47 = vector.extract_strided_slice %46 {offsets = [0, 0], sizes = [16, 64], strides = [1, 1]} : vector<16x128xf32> to vector<16x64xf32>
    %48 = arith.negf %47 : vector<16x64xf32>
    %49 = math.exp %48 : vector<16x64xf32>
    %cst_20 = arith.constant 1.000000e+00 : f32
    %50 = vector.broadcast %cst_20 : f32 to vector<16x64xf32>
    %51 = arith.addf %50, %49 : vector<16x64xf32>
    %52 = arith.divf %50, %51 : vector<16x64xf32>
    %53 = vector.extract_strided_slice %52 {offsets = [0, 0], sizes = [16, 32], strides = [1, 1]} : vector<16x64xf32> to vector<16x32xf32>
    %54 = vector.extract_strided_slice %52 {offsets = [0, 32], sizes = [16, 32], strides = [1, 1]} : vector<16x64xf32> to vector<16x32xf32>
    %55 = vector.extract_strided_slice %46 {offsets = [0, 64], sizes = [16, 32], strides = [1, 1]} : vector<16x128xf32> to vector<16x32xf32>
    %56 = math.tanh %55 : vector<16x32xf32>
    %57 = arith.mulf %53, %56 : vector<16x32xf32>
    %58 = arith.addf %54, %57 : vector<16x32xf32>
    %59 = vector.extract_strided_slice %46 {offsets = [0, 96], sizes = [16, 32], strides = [1, 1]} : vector<16x128xf32> to vector<16x32xf32>
    %c0_21 = arith.constant 0 : index
    %c0_22 = arith.constant 0 : index
    %c0_23 = arith.constant 0 : index
    %60 = vector.load %arg4[%c0_21, %c0_22, %c0_23] : memref<2x1x32xf32, #tpu.memory_space<vmem>>, vector<1x1x32xf32>
    %61 = vector.shape_cast %60 : vector<1x1x32xf32> to vector<1x32xf32>
    %62 = vector.broadcast %61 : vector<1x32xf32> to vector<16x32xf32>
    %63 = arith.mulf %62, %58 : vector<16x32xf32>
    %64 = arith.addf %59, %63 : vector<16x32xf32>
    %65 = arith.negf %64 : vector<16x32xf32>
    %66 = math.exp %65 : vector<16x32xf32>
    %cst_24 = arith.constant 1.000000e+00 : f32
    %67 = vector.broadcast %cst_24 : f32 to vector<16x32xf32>
    %68 = arith.addf %67, %66 : vector<16x32xf32>
    %69 = arith.divf %67, %68 : vector<16x32xf32>
    %70 = math.tanh %58 : vector<16x32xf32>
    %71 = arith.mulf %69, %70 : vector<16x32xf32>
    %cst_25 = arith.constant 0.000000e+00 : f32
    %72 = vector.broadcast %cst_25 : f32 to vector<16x32xf32>
    %73 = arith.maximumf %71, %72 : vector<16x32xf32>
    %c1 = arith.constant 1 : index
    %c0_26 = arith.constant 0 : index
    %c0_27 = arith.constant 0 : index
    %74 = vector.load %arg2[%c1, %c0_26, %c0_27] : memref<2x160x128xbf16, #tpu.memory_space<vmem>>, vector<1x160x128xbf16>
    %75 = vector.shape_cast %74 : vector<1x160x128xbf16> to vector<160x128xbf16>
    %76 = arith.truncf %73 : vector<16x32xf32> to vector<16x32xbf16>
    %cst_28 = arith.constant dense<0.000000e+00> : vector<64x32xf32>
    %77 = tpu.matmul %19, %76, %cst_28 {dimension_numbers = #tpu.dot_dimension_numbers<[1], [0], [0], [1], [0, 0, 1, 1], [], []>} : vector<64x16xbf16>, vector<16x32xbf16>, vector<64x32xf32> -> vector<64x32xf32>
    %78 = arith.truncf %77 : vector<64x32xf32> to vector<64x32xbf16>
    %c1_29 = arith.constant 1 : index
    %c0_30 = arith.constant 0 : index
    %c0_31 = arith.constant 0 : index
    %79 = vector.load %arg3[%c1_29, %c0_30, %c0_31] : memref<2x16x128xf32, #tpu.memory_space<vmem>>, vector<1x16x128xf32>
    %80 = vector.shape_cast %79 : vector<1x16x128xf32> to vector<16x128xf32>
    %81 = vector.extract_strided_slice %75 {offsets = [0, 0], sizes = [32, 128], strides = [1, 1]} : vector<160x128xbf16> to vector<32x128xbf16>
    %cst_32 = arith.constant dense<0.000000e+00> : vector<16x128xf32>
    %82 = tpu.matmul %76, %81, %cst_32 {dimension_numbers = #tpu.dot_dimension_numbers<[1], [0], [0], [1], [0, 0, 1, 1], [], []>} : vector<16x32xbf16>, vector<32x128xbf16>, vector<16x128xf32> -> vector<16x128xf32>
    %83 = arith.addf %80, %82 : vector<16x128xf32>
    %84 = vector.extract_strided_slice %78 {offsets = [0, 0], sizes = [16, 32], strides = [1, 1]} : vector<64x32xbf16> to vector<16x32xbf16>
    %85 = vector.extract_strided_slice %75 {offsets = [32, 0], sizes = [32, 128], strides = [1, 1]} : vector<160x128xbf16> to vector<32x128xbf16>
    %cst_33 = arith.constant dense<0.000000e+00> : vector<16x128xf32>
    %86 = tpu.matmul %84, %85, %cst_33 {dimension_numbers = #tpu.dot_dimension_numbers<[1], [0], [0], [1], [0, 0, 1, 1], [], []>} : vector<16x32xbf16>, vector<32x128xbf16>, vector<16x128xf32> -> vector<16x128xf32>
    %87 = arith.addf %83, %86 : vector<16x128xf32>
    %88 = vector.extract_strided_slice %78 {offsets = [16, 0], sizes = [16, 32], strides = [1, 1]} : vector<64x32xbf16> to vector<16x32xbf16>
    %89 = vector.extract_strided_slice %75 {offsets = [64, 0], sizes = [32, 128], strides = [1, 1]} : vector<160x128xbf16> to vector<32x128xbf16>
    %cst_34 = arith.constant dense<0.000000e+00> : vector<16x128xf32>
    %90 = tpu.matmul %88, %89, %cst_34 {dimension_numbers = #tpu.dot_dimension_numbers<[1], [0], [0], [1], [0, 0, 1, 1], [], []>} : vector<16x32xbf16>, vector<32x128xbf16>, vector<16x128xf32> -> vector<16x128xf32>
    %91 = arith.addf %87, %90 : vector<16x128xf32>
    %92 = vector.extract_strided_slice %78 {offsets = [32, 0], sizes = [16, 32], strides = [1, 1]} : vector<64x32xbf16> to vector<16x32xbf16>
    %93 = vector.extract_strided_slice %75 {offsets = [96, 0], sizes = [32, 128], strides = [1, 1]} : vector<160x128xbf16> to vector<32x128xbf16>
    %cst_35 = arith.constant dense<0.000000e+00> : vector<16x128xf32>
    %94 = tpu.matmul %92, %93, %cst_35 {dimension_numbers = #tpu.dot_dimension_numbers<[1], [0], [0], [1], [0, 0, 1, 1], [], []>} : vector<16x32xbf16>, vector<32x128xbf16>, vector<16x128xf32> -> vector<16x128xf32>
    %95 = arith.addf %91, %94 : vector<16x128xf32>
    %96 = vector.extract_strided_slice %78 {offsets = [48, 0], sizes = [16, 32], strides = [1, 1]} : vector<64x32xbf16> to vector<16x32xbf16>
    %97 = vector.extract_strided_slice %75 {offsets = [128, 0], sizes = [32, 128], strides = [1, 1]} : vector<160x128xbf16> to vector<32x128xbf16>
    %cst_36 = arith.constant dense<0.000000e+00> : vector<16x128xf32>
    %98 = tpu.matmul %96, %97, %cst_36 {dimension_numbers = #tpu.dot_dimension_numbers<[1], [0], [0], [1], [0, 0, 1, 1], [], []>} : vector<16x32xbf16>, vector<32x128xbf16>, vector<16x128xf32> -> vector<16x128xf32>
    %99 = arith.addf %95, %98 : vector<16x128xf32>
    %100 = vector.extract_strided_slice %99 {offsets = [0, 0], sizes = [16, 64], strides = [1, 1]} : vector<16x128xf32> to vector<16x64xf32>
    %101 = arith.negf %100 : vector<16x64xf32>
    %102 = math.exp %101 : vector<16x64xf32>
    %cst_37 = arith.constant 1.000000e+00 : f32
    %103 = vector.broadcast %cst_37 : f32 to vector<16x64xf32>
    %104 = arith.addf %103, %102 : vector<16x64xf32>
    %105 = arith.divf %103, %104 : vector<16x64xf32>
    %106 = vector.extract_strided_slice %105 {offsets = [0, 0], sizes = [16, 32], strides = [1, 1]} : vector<16x64xf32> to vector<16x32xf32>
    %107 = vector.extract_strided_slice %105 {offsets = [0, 32], sizes = [16, 32], strides = [1, 1]} : vector<16x64xf32> to vector<16x32xf32>
    %108 = vector.extract_strided_slice %99 {offsets = [0, 64], sizes = [16, 32], strides = [1, 1]} : vector<16x128xf32> to vector<16x32xf32>
    %109 = math.tanh %108 : vector<16x32xf32>
    %110 = arith.mulf %106, %109 : vector<16x32xf32>
    %111 = arith.addf %107, %110 : vector<16x32xf32>
    %112 = vector.extract_strided_slice %99 {offsets = [0, 96], sizes = [16, 32], strides = [1, 1]} : vector<16x128xf32> to vector<16x32xf32>
    %c1_38 = arith.constant 1 : index
    %c0_39 = arith.constant 0 : index
    %c0_40 = arith.constant 0 : index
    %113 = vector.load %arg4[%c1_38, %c0_39, %c0_40] : memref<2x1x32xf32, #tpu.memory_space<vmem>>, vector<1x1x32xf32>
    %114 = vector.shape_cast %113 : vector<1x1x32xf32> to vector<1x32xf32>
    %115 = vector.broadcast %114 : vector<1x32xf32> to vector<16x32xf32>
    %116 = arith.mulf %115, %111 : vector<16x32xf32>
    %117 = arith.addf %112, %116 : vector<16x32xf32>
    %118 = arith.negf %117 : vector<16x32xf32>
    %119 = math.exp %118 : vector<16x32xf32>
    %cst_41 = arith.constant 1.000000e+00 : f32
    %120 = vector.broadcast %cst_41 : f32 to vector<16x32xf32>
    %121 = arith.addf %120, %119 : vector<16x32xf32>
    %122 = arith.divf %120, %121 : vector<16x32xf32>
    %123 = math.tanh %111 : vector<16x32xf32>
    %124 = arith.mulf %122, %123 : vector<16x32xf32>
    %cst_42 = arith.constant 0.000000e+00 : f32
    %125 = vector.broadcast %cst_42 : f32 to vector<16x32xf32>
    %126 = arith.maximumf %124, %125 : vector<16x32xf32>
    %127 = tpu.concatenate %73, %58, %126, %111 in 1 : vector<16x32xf32>, vector<16x32xf32>, vector<16x32xf32>, vector<16x32xf32> -> vector<16x128xf32>
    %c0_43 = arith.constant 0 : index
    %c0_44 = arith.constant 0 : index
    %128 = vector.load %arg5[%c0_43, %c0_44] : memref<16x128xf32, #tpu.memory_space<vmem>>, vector<16x128xf32>
    tpu.vector_store %arg5[%c0_43, %c0_44], %127 {strides = array<i32>} : memref<16x128xf32, #tpu.memory_space<vmem>>, vector<16x128xf32>,
    return
  }
}

</mosaic_0001>

<bundles_post_ra>
// kernel: gconv_lstm_model_forward.1
= control target key start
LH: loop header
LB: loop body
LE: loop exit
PB: predicated region body
PF: predicated region fallthrough
CT: control target
= control target key end

     0   :  { %vm34_vm0 = vcmask 130048   ;;  %v23_v3 = vlaneseq  ;;  %v1651_v7 = vmov 0.0   ;;  %vm1652_vm3 = vmmov 0   ;;  %s1653_s22 = smov 64   ;;  %s1654_s23 = smov 32   ;;  %s1917_s0 = inlined_call_operand.vmem [shape: f32[16,16], index: 0, kind: input, shape index: {}]   ;;  %s1918_s1 = inlined_call_operand.vmem [shape: f32[16,32], index: 1, kind: input, shape index: {}]   ;;  %s1919_s2 = inlined_call_operand.vmem [shape: bf16[2,160,128], index: 2, kind: input, shape index: {}]   ;;  %s1920_s3 = inlined_call_operand.vmem [shape: f32[2,16,128], index: 3, kind: input, shape index: {}]   ;;  %s1921_s4 = inlined_call_operand.vmem [shape: f32[2,1,32], index: 4, kind: input, shape index: {}]   ;;  %s1922_s5 = inlined_call_operand.vmem [shape: f32[16,128], index: 5, kind: output, shape index: {}]  }
   0x1   :  { %v21_v0 = vld [vmem:[%s1917_s0] sm:$0xff]  ;;  %v22_v1 = vld [vmem:[%s1917_s0 + $0x8] sm:$0xff]  ;;  %vm400_vm4 = vcmask 261120   ;;  %v1585_v42 = vld [vmem:[%s1919_s2 + $0x10] sm:$0xff]   ;;  %s1655_s24 = smov 96   ;;  %vm1266_vm5 = vcmask 523264  }
   0x2   :  { %v1530_v2 = vpack.c.bf16 %v22_v1, %v21_v0  ;;  %1413 = vmatprep.mubr.msk.f32.mxu0 %vm34_vm0, %v21_v0  ;;  %1420 = vmatprep.mubr.msk.f32.mxu1 %vm34_vm0, %v21_v0  ;;  %v24_v4 = vshrl.u32 %v23_v3, 7  ;;  %v27_v6 = vand.u32 127, %v23_v3  ;;  %v282_v22 = vld [vmem:[%s1918_s1] sm:$0xff]  ;;  %v283_v23 = vld [vmem:[%s1918_s1 + $0x8] sm:$0xff]  ;;  %v1586_v43 = vld [vmem:[%s1919_s2 + $0x18] sm:$0xff]   ;;  %vm1269_vm6 = vcmask 785408  }
   0x3   :  { %v304_v26 = vpack.c.bf16 %v283_v23, %v282_v22  ;;  %v1583_v27 = vld [vmem:[%s1919_s2] sm:$0xff]   ;;  %v1584_v28 = vld [vmem:[%s1919_s2 + $0x8] sm:$0xff]   ;;  %v1589_v46 = vld [vmem:[%s1919_s2 + $0x30] sm:$0xff]  }
   0x4   :  { %1531 = vmatprep.subr.bf16.mxu0 %v1530_v2  ;;  %v25_v5 = vadd.s32 8, %v24_v4  ;;  %vm28_vm2 = vcmp.eq.s32.totalorder %v24_v4, %v27_v6  ;;  %v1587_v44 = vld [vmem:[%s1919_s2 + $0x20] sm:$0xff]   ;;  %v1588_v45 = vld [vmem:[%s1919_s2 + $0x28] sm:$0xff]   ;;  %v1590_v47 = vld [vmem:[%s1919_s2 + $0x38] sm:$0xff]  }
   0x5   :  { %1533 = vmatpush3.bf16.msra.mxu0 %v1530_v2  ;;  %v1278_v11 = vsel %vm28_vm2, 1.0, %v1651_v7  ;;  %v1591_v53 = vld [vmem:[%s1919_s2 + $0x40] sm:$0xff]   ;;  %v1592_v55 = vld [vmem:[%s1919_s2 + $0x48] sm:$0xff]  }
   0x6   :  { %vm29_vm1 = vcmp.eq.s32.totalorder %v25_v5, %v27_v6  ;;  %v386_v56 = vld [vmem:[%s1920_s3] sm:$0xff]  ;;  %v387_v58 = vld [vmem:[%s1920_s3 + $0x8] sm:$0xff] }
   0x7   :  { %v1279_v8 = vsel %vm29_vm1, 1.0, %v1651_v7 }
   0x8   :  { %1414 = vmatmul.mubr.msk.f32.vlgmr.msra.gmra.mrb[0].mxu0 %vm34_vm0, %v22_v1 }
   0x9   :  { %1427 = vmatprep.mubr.msk.f32.mxu0 %vm34_vm0, %v21_v0 }
  0xdb   :  { %v1415_v9 = vpop.f32.mrb[0].mxu0 }
  0xdc   :  { %v117_v10 = vmul.f32 2.0, %v1415_v9  ;;  %v107_v12 = vpop.f32.mrb[1].mxu0 }
  0xdd   :  { %v116_v13 = vmul.f32 2.0, %v107_v12 }
  0xde   :  { %v119_v14 = vsub.f32 %v117_v10, %v1279_v8 }
  0xdf   :  { %v118_v15 = vsub.f32 %v116_v13, %v1278_v11 }
  0xe1   :  { %v1698_v16 = vpack.c.bf16 %v119_v14, %v118_v15 }
  0xe3   :  { %1535 = vmatprep.subr.bf16.mxu1 %v1698_v16 }
  0xe4   :  { %1537 = vmatpush3.bf16.msra.mxu1 %v1698_v16 }
  0xe7   :  { %1421 = vmatmul.mubr.msk.f32.vlgmr.msra.gmra.mrb[0].mxu1 %vm34_vm0, %v22_v1 }
  0xe8   :  { %1482 = vmatprep.mubr.msk.bf16.mxu1 %vm34_vm0, %v1530_v2 }
 0x1ba   :  { %v1422_v17 = vpop.f32.mrb[0].mxu1 }
 0x1bb   :  { %v196_v18 = vmul.f32 2.0, %v1422_v17  ;;  %v186_v19 = vpop.f32.mrb[1].mxu1 }
 0x1bc   :  { %v195_v20 = vmul.f32 2.0, %v186_v19 }
 0x1bd   :  { %v198_v21 = vsub.f32 %v196_v18, %v22_v1 }
 0x1be   :  { %v197_v24 = vsub.f32 %v195_v20, %v21_v0  ;;  %v1307_v20 = vld [vmem:[%s1921_s4] ss:$0 sm:$0xff] }
 0x1c0   :  { %v1710_v25 = vpack.c.bf16 %v198_v21, %v197_v24 }
 0x1c2   :  { %1539 = vmatprep.subr.bf16.mxu0 %v1710_v25 }
 0x1c3   :  { %1541 = vmatpush3.bf16.msra.mxu0 %v1710_v25 }
 0x1c4   :  { %1430 = vmatprep.subr.bf16.mxu0 %v304_v26 }
 0x1c6   :  { %1428 = vmatmul.mubr.msk.f32.vlgmr.msra.gmra.mrb[2].mxu0 %vm34_vm0, %v22_v1 }
 0x1c7   :  { %1431 = vmatpush3.bf16.msra.mxu0 %v304_v26  ;;  %1432 = vmatprep.mubr.msk.bf16.mxu0 %vm34_vm0, %v1530_v2 }
 0x1c8   :  { %1440 = vmatprep.subr.bf16.mxu0 %v1651_v7 }
 0x1ca   :  { %1433 = vmatmul.mubr.msk.bf16.vlgmr.msra.gmra.mrb[4].mxu0 %vm34_vm0, %v1698_v16 }
 0x1cb   :  { %1436 = vmatprep.mubr.msk.bf16.mxu0 %vm34_vm0, %v1710_v25  ;;  %1441 = vmatpush3.bf16.msra.mxu0 %v1583_v27 }
 0x1cc   :  { %1442 = vmatprep.subr.bf16.mxu0 %v1651_v7 }
 0x1cf   :  { %1443 = vmatpush3.bf16.msra.mxu0 %v1584_v28 }
 0x1d0   :  { %1448 = vmatprep.subr.bf16.mxu0 %v1651_v7 }
 0x299   :  { %v1429_v29 = vpop.f32.mrb[2].mxu0 }
 0x29a   :  { %v275_v30 = vmul.f32 2.0, %v1429_v29  ;;  %v265_v31 = vpop.f32.mrb[3].mxu0 }
 0x29b   :  { %v274_v32 = vmul.f32 2.0, %v265_v31 }
 0x29c   :  { %v277_v33 = vsub.f32 %v275_v30, %v119_v14 }
 0x29d   :  { %v276_v34 = vsub.f32 %v274_v32, %v118_v15  ;;  %v1434_v35 = vpop.f32.mrb[4].mxu0 }
 0x29e   :  { %v351_v36 = vpop.f32.mrb[5].mxu0 }
 0x29f   :  { %v1729_v37 = vpack.c.bf16 %v277_v33, %v276_v34  ;;  %v1435_v38 = vpop.f32.mrb[6].mxu0 }
 0x2a0   :  { %v383_v39 = vpack.c.bf16 %v1435_v38, %v1434_v35  ;;  %v354_v40 = vpop.f32.mrb[7].mxu0 }
 0x2a1   :  { %v382_v41 = vpack.c.bf16 %v354_v40, %v351_v36  ;;  %1437 = vmatmul.mubr.msk.bf16.gmra.mrb[8].mxu0 %vm34_vm0, %v1729_v37 }
 0x2a2   :  { %1444 = vmatprep.mubr.msk.bf16.mxu0 %vm1652_vm3, %v1651_v7 }
 0x2a9   :  { %1445 = vmatmul.mubr.msk.bf16.vlgmr.msra.gmra.mrb[12].mxu0 %vm400_vm4, %v304_v26 }
 0x2aa   :  { %1449 = vmatpush3.bf16.msra.mxu0 %v1585_v42  ;;  %1452 = vmatprep.mubr.msk.bf16.mxu0 %vm1652_vm3, %v1651_v7 }
 0x2ab   :  { %1450 = vmatprep.subr.bf16.mxu0 %v1651_v7 }
 0x2ae   :  { %1451 = vmatpush3.bf16.msra.mxu0 %v1586_v43 }
 0x2af   :  { %1456 = vmatprep.subr.bf16.mxu0 %v1651_v7 }
 0x2b5   :  { %1453 = vmatmul.mubr.msk.bf16.vlgmr.msra.gmra.mrb[12].mxu0 %vm400_vm4, %v382_v41 }
 0x2b6   :  { %1457 = vmatpush3.bf16.msra.mxu0 %v1587_v44  ;;  %1460 = vmatprep.mubr.msk.bf16.mxu0 %vm1652_vm3, %v1651_v7 }
 0x2b7   :  { %1458 = vmatprep.subr.bf16.mxu0 %v1651_v7 }
 0x2ba   :  { %1459 = vmatpush3.bf16.msra.mxu0 %v1588_v45 }
 0x2bb   :  { %1464 = vmatprep.subr.bf16.mxu0 %v1651_v7 }
 0x2c1   :  { %1461 = vmatmul.mubr.msk.bf16.vlgmr.msra.gmra.mrb[12].mxu0 %vm400_vm4, %v383_v39 }
 0x2c2   :  { %1465 = vmatpush3.bf16.msra.mxu0 %v1589_v46  ;;  %1468 = vmatprep.mubr.msk.bf16.mxu0 %vm1652_vm3, %v1651_v7 }
 0x2c3   :  { %1466 = vmatprep.subr.bf16.mxu0 %v1651_v7 }
 0x2c6   :  { %1467 = vmatpush3.bf16.msra.mxu0 %v1590_v47 }
 0x2c7   :  { %1472 = vmatprep.subr.bf16.mxu0 %v1651_v7 }
 0x374   :  { %v1438_v48 = vpop.f32.mrb[8].mxu0 }
 0x375   :  { %v367_v49 = vpop.f32.mrb[9].mxu0 }
 0x376   :  { %v1439_v50 = vpop.f32.mrb[10].mxu0 }
 0x377   :  { %v385_v51 = vpack.c.bf16 %v1439_v50, %v1438_v48  ;;  %v370_v52 = vpop.f32.mrb[11].mxu0  ;;  %v1594_v50 = vld [vmem:[%s1919_s2 + $0x58] sm:$0xff]  }
 0x378   :  { %v384_v54 = vpack.c.bf16 %v370_v52, %v367_v49  ;;  %v1593_v49 = vld [vmem:[%s1919_s2 + $0x50] sm:$0xff]  }
 0x37a   :  { %1469 = vmatmul.mubr.msk.bf16.vlgmr.msra.gmra.mrb[12].mxu0 %vm400_vm4, %v384_v54 }
 0x37b   :  { %1473 = vmatpush3.bf16.msra.mxu0 %v1591_v53  ;;  %1476 = vmatprep.mubr.msk.bf16.mxu0 %vm1652_vm3, %v1651_v7 }
 0x37c   :  { %1474 = vmatprep.subr.bf16.mxu0 %v1651_v7 }
 0x37f   :  { %1475 = vmatpush3.bf16.msra.mxu0 %v1592_v55  ;;  %v1597_v55 = vld [vmem:[%s1919_s2 + $0x70] sm:$0xff]  }
 0x386   :  { %1477 = vmatmul.mubr.msk.bf16.vlgmr.msra.gmra.mrb[12].mxu0 %vm400_vm4, %v385_v51 }
 0x459   :  { %v670_v57 = vpop.f32.mrb[12].mxu0 }
 0x45a   :  { %v1542_v59 = vadd.f32 %v670_v57, %v386_v56  ;;  %v1478_v60 = vpop.f32.mrb[13].mxu0  ;;  %v1598_v57 = vld [vmem:[%s1919_s2 + $0x78] sm:$0xff]  }
 0x45b   :  { %v673_v61 = vpop.f32.mrb[14].mxu0 }
 0x45c   :  { %1603 = vtanh.f32 %v1542_v59  ;;  %v1543_v62 = vadd.f32 %v673_v61, %v387_v58  ;;  %v1479_v63 = vpop.f32.mrb[15].mxu0  ;;  %v1305_v2 = vmul.f32 -1.442695, %v1542_v59 }
 0x45e   :  { %1605 = vtanh.f32 %v1543_v62  ;;  %v1306_v3 = vmul.f32 -1.442695, %v1543_v62 }
 0x45f   :  { %1607 = vpow2.f32 %v1305_v2  ;;  %v1601_v2 = vld [vmem:[%s1919_s2 + $0x90] sm:$0xff]  }
 0x460   :  { %1609 = vpow2.f32 %v1306_v3  ;;  %v1602_v3 = vld [vmem:[%s1919_s2 + $0x98] sm:$0xff]  }
 0x466   :  { %v1604_v0 = vpop.eup %1603 }
 0x467   :  { %695 = vrot.lane.b32.xlu0 %v1604_v0, %s1653_s22  ;;  %v1599_v0 = vld [vmem:[%s1919_s2 + $0x80] sm:$0xff]  }
 0x468   :  { %v1606_v1 = vpop.eup %1605 }
 0x469   :  { %v1608_v4 = vpop.eup %1607 }
 0x46a   :  { %v685_v5 = vadd.f32 1.0, %v1608_v4  ;;  %v1610_v6 = vpop.eup %1609  ;;  %v1334_v4 = vld [vmem:[%s1920_s3 + $0x10] sm:$0xff] }
 0x46b   :  { %697 = vrot.lane.b32.xlu0 %v1606_v1, %s1653_s22  ;;  %v686_v8 = vadd.f32 1.0, %v1610_v6  ;;  %v1600_v1 = vld [vmem:[%s1919_s2 + $0x88] sm:$0xff]   ;;  %v1335_v6 = vld [vmem:[%s1920_s3 + $0x18] sm:$0xff] }
 0x46c   :  { %1611 = vrcp.f32 %v685_v5 }
 0x46d   :  { %1613 = vrcp.f32 %v686_v8 }
 0x476   :  { %v1612_v9 = vpop.eup %1611 }
 0x477   :  { %v1614_v12 = vpop.eup %1613 }
 0x4d9   :  { %v696_v10 = vpop.permute.xlu0 %695 }
 0x4da   :  { %v701_v11 = vmul.f32 %v1612_v9, %v696_v10 }
 0x4dc   :  { %705 = vrot.lane.b32.xlu1 %v701_v11, %s1654_s23 }
 0x4dd   :  { %v698_v13 = vpop.permute.xlu0 %697 }
 0x4de   :  { %v702_v14 = vmul.f32 %v1614_v12, %v698_v13 }
 0x4e0   :  { %707 = vrot.lane.b32.xlu1 %v702_v14, %s1654_s23 }
 0x54e   :  { %v706_v15 = vpop.permute.xlu1 %705 }
 0x54f   :  { %v1789_v17 = vadd.f32 %v1612_v9, %v706_v15 }
 0x551   :  { %722 = vrot.lane.b32.xlu0 %v1789_v17, %s1655_s24  ;;  %1615 = vtanh.f32 %v1789_v17 }
 0x552   :  { %v708_v18 = vpop.permute.xlu1 %707 }
 0x553   :  { %v1793_v19 = vadd.f32 %v1614_v12, %v708_v18 }
 0x555   :  { %724 = vrot.lane.b32.xlu1 %v1793_v19, %s1655_s24  ;;  %1617 = vtanh.f32 %v1793_v19 }
 0x55b   :  { %v1616_v26 = vpop.eup %1615 }
 0x55f   :  { %v1618_v27 = vpop.eup %1617 }
 0x5c3   :  { %v723_v21 = vpop.permute.xlu0 %722 }
 0x5c4   :  { %v728_v22 = vmul.f32 %v1307_v20, %v723_v21 }
 0x5c6   :  { %732 = vrot.lane.b32.xlu0 %v728_v22, %s1655_s24 }
 0x5c7   :  { %v725_v23 = vpop.permute.xlu1 %724 }
 0x5c8   :  { %v729_v24 = vmul.f32 %v1307_v20, %v725_v23 }
 0x5ca   :  { %756 = vrot.lane.b32.xlu0 %v1616_v26, %s1653_s22  ;;  %734 = vrot.lane.b32.xlu1 %v729_v24, %s1655_s24 }
 0x5ce   :  { %758 = vrot.lane.b32.xlu1 %v1618_v27, %s1653_s22 }
 0x638   :  { %v733_v28 = vpop.permute.xlu0 %732 }
 0x639   :  { %v738_v29 = vadd.f32 %v1542_v59, %v733_v28 }
 0x63b   :  { %v1308_v30 = vmul.f32 -1.442695, %v738_v29 }
 0x63c   :  { %v735_v31 = vpop.permute.xlu1 %734  ;;  %v757_v40 = vpop.permute.xlu0 %756 }
 0x63d   :  { %1619 = vpow2.f32 %v1308_v30  ;;  %v739_v32 = vadd.f32 %v1543_v62, %v735_v31 }
 0x63f   :  { %v1309_v33 = vmul.f32 -1.442695, %v739_v32 }
 0x640   :  { %v759_v43 = vpop.permute.xlu1 %758 }
 0x641   :  { %1621 = vpow2.f32 %v1309_v33 }
 0x647   :  { %v1620_v34 = vpop.eup %1619 }
 0x648   :  { %v746_v35 = vadd.f32 1.0, %v1620_v34  ;;  %v1354_v34 = vld [vmem:[%s1921_s4 + $0x1] ss:$0 sm:$0xff] }
 0x64a   :  { %1623 = vrcp.f32 %v746_v35 }
 0x64b   :  { %v1622_v36 = vpop.eup %1621 }
 0x64c   :  { %v747_v38 = vadd.f32 1.0, %v1622_v36 }
 0x64e   :  { %1625 = vrcp.f32 %v747_v38 }
 0x654   :  { %v1624_v39 = vpop.eup %1623 }
 0x655   :  { %v1806_v41 = vmul.f32 %v1624_v39, %v757_v40 }
 0x657   :  { %v764_v45 = vmax.f32 %v1806_v41, 0.0 }
 0x658   :  { %v1626_v42 = vpop.eup %1625 }
 0x659   :  { %v1808_v44 = vmul.f32 %v1626_v42, %v759_v43 }
 0x65b   :  { %v765_v46 = vmax.f32 %v1808_v44, 0.0 }
 0x65d   :  { %v787_v47 = vpack.c.bf16 %v765_v46, %v764_v45 }
 0x65f   :  { %789 = vrot.lane.b32.xlu0 %v787_v47, %s1654_s23 }
 0x6d1   :  { %v790_v48 = vpop.permute.xlu0 %789 }
 0x6d2   :  { %1480 = vmatprep.subr.bf16.mxu1 %v790_v48 }
 0x6d3   :  { %1481 = vmatpush3.bf16.msra.mxu1 %v790_v48 }
 0x6d4   :  { %1490 = vmatprep.subr.bf16.mxu1 %v1651_v7 }
 0x6d6   :  { %1483 = vmatmul.mubr.msk.bf16.vlgmr.msra.gmra.mrb[4].mxu1 %vm34_vm0, %v1698_v16  ;;  %v1595_v16 = vld [vmem:[%s1919_s2 + $0x60] sm:$0xff]  }
 0x6d7   :  { %1486 = vmatprep.mubr.msk.bf16.mxu1 %vm34_vm0, %v1710_v25  ;;  %1491 = vmatpush3.bf16.msra.mxu1 %v1593_v49  ;;  %v1596_v25 = vld [vmem:[%s1919_s2 + $0x68] sm:$0xff]  }
 0x6d8   :  { %1492 = vmatprep.subr.bf16.mxu1 %v1651_v7 }
 0x6db   :  { %1493 = vmatpush3.bf16.msra.mxu1 %v1594_v50 }
 0x6dc   :  { %1498 = vmatprep.subr.bf16.mxu1 %v1651_v7 }
 0x6de   :  { %1487 = vmatmul.mubr.msk.bf16.gmra.mrb[8].mxu1 %vm34_vm0, %v1729_v37 }
 0x6df   :  { %1494 = vmatprep.mubr.msk.bf16.mxu1 %vm1652_vm3, %v1651_v7 }
 0x6e6   :  { %1495 = vmatmul.mubr.msk.bf16.vlgmr.msra.gmra.mrb[12].mxu1 %vm400_vm4, %v790_v48 }
 0x6e7   :  { %1499 = vmatpush3.bf16.msra.mxu1 %v1595_v16  ;;  %1502 = vmatprep.mubr.msk.bf16.mxu1 %vm1652_vm3, %v1651_v7 }
 0x6e8   :  { %1500 = vmatprep.subr.bf16.mxu1 %v1651_v7 }
 0x6eb   :  { %1501 = vmatpush3.bf16.msra.mxu1 %v1596_v25 }
 0x6ec   :  { %1506 = vmatprep.subr.bf16.mxu1 %v1651_v7 }
 0x7a9   :  { %v1484_v37 = vpop.f32.mrb[4].mxu1 }
 0x7aa   :  { %v826_v51 = vpop.f32.mrb[5].mxu1 }
 0x7ab   :  { %v1485_v52 = vpop.f32.mrb[6].mxu1 }
 0x7ac   :  { %v858_v53 = vpack.c.bf16 %v1485_v52, %v1484_v37  ;;  %v829_v54 = vpop.f32.mrb[7].mxu1 }
 0x7ad   :  { %v857_v56 = vpack.c.bf16 %v829_v54, %v826_v51 }
 0x7af   :  { %1503 = vmatmul.mubr.msk.bf16.vlgmr.msra.gmra.mrb[12].mxu1 %vm400_vm4, %v857_v56 }
 0x7b0   :  { %1507 = vmatpush3.bf16.msra.mxu1 %v1597_v55  ;;  %1510 = vmatprep.mubr.msk.bf16.mxu1 %vm1652_vm3, %v1651_v7 }
 0x7b1   :  { %v1488_v58 = vpop.f32.mrb[8].mxu1  ;;  %1508 = vmatprep.subr.bf16.mxu1 %v1651_v7 }
 0x7b2   :  { %v842_v59 = vpop.f32.mrb[9].mxu1 }
 0x7b3   :  { %v1489_v60 = vpop.f32.mrb[10].mxu1 }
 0x7b4   :  { %v860_v61 = vpack.c.bf16 %v1489_v60, %v1488_v58  ;;  %v845_v62 = vpop.f32.mrb[11].mxu1  ;;  %1509 = vmatpush3.bf16.msra.mxu1 %v1598_v57 }
 0x7b5   :  { %v859_v63 = vpack.c.bf16 %v845_v62, %v842_v59  ;;  %1514 = vmatprep.subr.bf16.mxu1 %v1651_v7 }
 0x7bb   :  { %1511 = vmatmul.mubr.msk.bf16.vlgmr.msra.gmra.mrb[12].mxu1 %vm400_vm4, %v858_v53 }
 0x7bc   :  { %1515 = vmatpush3.bf16.msra.mxu1 %v1599_v0  ;;  %1518 = vmatprep.mubr.msk.bf16.mxu1 %vm1652_vm3, %v1651_v7 }
 0x7bd   :  { %1516 = vmatprep.subr.bf16.mxu1 %v1651_v7 }
 0x7c0   :  { %1517 = vmatpush3.bf16.msra.mxu1 %v1600_v1 }
 0x7c1   :  { %1522 = vmatprep.subr.bf16.mxu1 %v1651_v7 }
 0x7c7   :  { %1519 = vmatmul.mubr.msk.bf16.vlgmr.msra.gmra.mrb[12].mxu1 %vm400_vm4, %v859_v63 }
 0x7c8   :  { %1523 = vmatpush3.bf16.msra.mxu1 %v1601_v2  ;;  %1526 = vmatprep.mubr.msk.bf16.mxu1 %vm1652_vm3, %v1651_v7 }
 0x7c9   :  { %1524 = vmatprep.subr.bf16.mxu1 %v1651_v7 }
 0x7cc   :  { %1525 = vmatpush3.bf16.msra.mxu1 %v1602_v3 }
 0x7d3   :  { %1527 = vmatmul.mubr.msk.bf16.vlgmr.msra.gmra.mrb[12].mxu1 %vm400_vm4, %v860_v61 }
 0x8a6   :  { %v1145_v5 = vpop.f32.mrb[12].mxu1 }
 0x8a7   :  { %v1544_v8 = vadd.f32 %v1334_v4, %v1145_v5  ;;  %v1528_v9 = vpop.f32.mrb[13].mxu1 }
 0x8a8   :  { %v1148_v10 = vpop.f32.mrb[14].mxu1 }
 0x8a9   :  { %1627 = vtanh.f32 %v1544_v8  ;;  %v1545_v11 = vadd.f32 %v1335_v6, %v1148_v10  ;;  %v1529_v12 = vpop.f32.mrb[15].mxu1  ;;  %v1351_v14 = vmul.f32 -1.442695, %v1544_v8 }
 0x8ab   :  { %1629 = vtanh.f32 %v1545_v11  ;;  %v1352_v15 = vmul.f32 -1.442695, %v1545_v11 }
 0x8ac   :  { %1631 = vpow2.f32 %v1351_v14 }
 0x8ad   :  { %1633 = vpow2.f32 %v1352_v15 }
 0x8b3   :  { %v1628_v7 = vpop.eup %1627 }
 0x8b4   :  { %1170 = vrot.lane.b32.xlu1 %v1628_v7, %s1653_s22 }
 0x8b5   :  { %v1630_v13 = vpop.eup %1629 }
 0x8b6   :  { %1172 = vrot.lane.b32.xlu0 %v1630_v13, %s1653_s22  ;;  %v1632_v18 = vpop.eup %1631 }
 0x8b7   :  { %v1634_v20 = vpop.eup %1633  ;;  %v1160_v21 = vadd.f32 1.0, %v1632_v18 }
 0x8b8   :  { %v1161_v22 = vadd.f32 1.0, %v1634_v20 }
 0x8b9   :  { %1635 = vrcp.f32 %v1160_v21 }
 0x8ba   :  { %1637 = vrcp.f32 %v1161_v22 }
 0x8c3   :  { %v1636_v23 = vpop.eup %1635 }
 0x8c4   :  { %v1638_v27 = vpop.eup %1637 }
 0x926   :  { %v1171_v24 = vpop.permute.xlu1 %1170 }
 0x927   :  { %v1176_v26 = vmul.f32 %v1636_v23, %v1171_v24 }
 0x928   :  { %v1173_v28 = vpop.permute.xlu0 %1172 }
 0x929   :  { %1180 = vrot.lane.b32.xlu1 %v1176_v26, %s1654_s23  ;;  %v1177_v29 = vmul.f32 %v1638_v27, %v1173_v28 }
 0x92b   :  { %1182 = vrot.lane.b32.xlu0 %v1177_v29, %s1654_s23 }
 0x99b   :  { %v1181_v30 = vpop.permute.xlu1 %1180 }
 0x99c   :  { %v1186_v31 = vadd.f32 %v1636_v23, %v1181_v30 }
 0x99d   :  { %v1183_v32 = vpop.permute.xlu0 %1182 }
 0x99e   :  { %1198 = vrot.lane.b32.xlu1 %v1186_v31, %s1655_s24  ;;  %v1187_v33 = vadd.f32 %v1638_v27, %v1183_v32  ;;  %1639 = vtanh.f32 %v1186_v31 }
 0x9a0   :  { %1200 = vrot.lane.b32.xlu0 %v1187_v33, %s1655_s24  ;;  %1641 = vtanh.f32 %v1187_v33 }
 0x9a8   :  { %v1640_v40 = vpop.eup %1639 }
 0x9aa   :  { %v1642_v42 = vpop.eup %1641 }
 0xa10   :  { %v1199_v35 = vpop.permute.xlu1 %1198 }
 0xa11   :  { %v1204_v36 = vmul.f32 %v1354_v34, %v1199_v35 }
 0xa12   :  { %v1201_v38 = vpop.permute.xlu0 %1200 }
 0xa13   :  { %1208 = vrot.lane.b32.xlu1 %v1204_v36, %s1655_s24  ;;  %v1205_v39 = vmul.f32 %v1354_v34, %v1201_v38 }
 0xa15   :  { %1210 = vrot.lane.b32.xlu0 %v1205_v39, %s1655_s24 }
 0xa17   :  { %1232 = vrot.lane.b32.xlu1 %v1640_v40, %s1653_s22 }
 0xa19   :  { %1234 = vrot.lane.b32.xlu0 %v1642_v42, %s1653_s22 }
 0xa1b   :  { %1244 = vrot.lane.b32.xlu1 %v764_v45, %s1654_s23 }
 0xa1d   :  { %1246 = vrot.lane.b32.xlu0 %v765_v46, %s1654_s23 }
 0xa85   :  { %v1209_v43 = vpop.permute.xlu1 %1208 }
 0xa86   :  { %v1214_v47 = vadd.f32 %v1544_v8, %v1209_v43 }
 0xa87   :  { %v1211_v49 = vpop.permute.xlu0 %1210 }
 0xa88   :  { %v1355_v48 = vmul.f32 -1.442695, %v1214_v47  ;;  %v1215_v50 = vadd.f32 %v1545_v11, %v1211_v49 }
 0xa89   :  { %v1233_v45 = vpop.permute.xlu1 %1232 }
 0xa8a   :  { %1643 = vpow2.f32 %v1355_v48  ;;  %v1356_v16 = vmul.f32 -1.442695, %v1215_v50 }
 0xa8b   :  { %v1235_v46 = vpop.permute.xlu0 %1234 }
 0xa8c   :  { %1645 = vpow2.f32 %v1356_v16 }
 0xa8d   :  { %v1245_v57 = vpop.permute.xlu1 %1244 }
 0xa8e   :  { %v1264_v60 = vsel %vm400_vm4, %v1245_v57, %v1789_v17 }
 0xa8f   :  { %v1247_v58 = vpop.permute.xlu0 %1246 }
 0xa90   :  { %v1265_v1 = vsel %vm400_vm4, %v1247_v58, %v1793_v19 }
 0xa94   :  { %v1644_v25 = vpop.eup %1643 }
 0xa95   :  { %v1222_v37 = vadd.f32 1.0, %v1644_v25 }
 0xa96   :  { %v1646_v51 = vpop.eup %1645 }
 0xa97   :  { %1647 = vrcp.f32 %v1222_v37  ;;  %v1223_v52 = vadd.f32 1.0, %v1646_v51 }
 0xa99   :  { %1649 = vrcp.f32 %v1223_v52 }
 0xaa1   :  { %v1648_v41 = vpop.eup %1647 }
 0xaa2   :  { %v1238_v53 = vmul.f32 %v1648_v41, %v1233_v45 }
 0xaa3   :  { %v1650_v54 = vpop.eup %1649 }
 0xaa4   :  { %v1240_v44 = vmax.f32 %v1238_v53, 0.0  ;;  %v1239_v55 = vmul.f32 %v1650_v54, %v1235_v46 }
 0xaa6   :  { %1252 = vrot.lane.b32.xlu1 %v1240_v44, %s1655_s24  ;;  %v1241_v56 = vmax.f32 %v1239_v55, 0.0 }
 0xaa8   :  { %1254 = vrot.lane.b32.xlu0 %v1241_v56, %s1655_s24 }
 0xaaa   :  { %1258 = vrot.lane.b32.xlu1 %v1186_v31, %s1653_s22 }
 0xaac   :  { %1260 = vrot.lane.b32.xlu0 %v1187_v33, %s1653_s22 }
 0xb18   :  { %v1253_v59 = vpop.permute.xlu1 %1252 }
 0xb19   :  { %v1267_v62 = vsel %vm1266_vm5, %v1264_v60, %v1253_v59 }
 0xb1a   :  { %v1255_v61 = vpop.permute.xlu0 %1254 }
 0xb1b   :  { %v1268_v2 = vsel %vm1266_vm5, %v1265_v1, %v1255_v61 }
 0xb1c   :  { %v1259_v63 = vpop.permute.xlu1 %1258 }
 0xb1d   :  { %v1270_v0 = vsel %vm1269_vm6, %v1267_v62, %v1259_v63 }
 0xb1e   :  { %1272 = vst [vmem:[%s1922_s5] sm:$0xff] %v1270_v0  ;;  %v1261_v3 = vpop.permute.xlu0 %1260 }
 0xb1f   :  { %v1271_v4 = vsel %vm1269_vm6, %v1268_v2, %v1261_v3 }
 0xb20   :  { %1273 = vst [vmem:[%s1922_s5 + $0x8] sm:$0xff] %v1271_v4 }

</bundles_post_ra>
